<compile_context>
chip_gen: v7x
topology: tpu7x:2x2x1
jax: 0.10.0
libtpu: 0.0.40
codegen_flags: <defaults>
</compile_context>

<pallas_src>
import functools

import jax
import jax.numpy as jnp
from jax.experimental import pallas as pl
from jax.experimental.pallas import tpu as pltpu


def _relu_kernel(x_ref, o_ref):
    # Elementwise hot path: one VPU vmax per vreg on the whole VMEM tile.
    o_ref[...] = jnp.maximum(x_ref[...], jnp.zeros((), x_ref.dtype))


def _sublane_granule(dtype):
    # Sub-32-bit dtypes pack along sublanes: one vreg is [8,128] f32,
    # [16,128] bf16, [32,128] int8/fp8.
    return {4: 8, 2: 16, 1: 32}.get(jnp.dtype(dtype).itemsize, 8)


def _tile_params():
    """Generation-aware (tile_bytes, vmem_limit_bytes).

    In + out are each double-buffered, so VMEM use ~= 4 * tile_bytes.
    """
    try:
        info = pltpu.get_tpu_info()
        vmem_cap = int(getattr(info, "vmem_capacity_bytes", 128 << 20))
    except Exception:  # not a TPU / query unavailable: conservative defaults
        vmem_cap = 128 << 20
    if vmem_cap <= (64 << 20):
        # v7x-class: very fast HBM, only 64 MiB physical VMEM.  8 MiB tiles
        # (4x = 32 MiB double-buffered) cut per-step overhead to <10%;
        # explicit 48 MiB scoped limit stays well under physical VMEM.
        return 8 << 20, 48 << 20
    # v5e / v6e (128 MiB VMEM): 2 MiB tiles are already ~85% of the HBM
    # roofline and fit comfortably under v5e's 16 MiB scoped default.
    return 2 << 20, 24 << 20


def _relu_slab(slab, tile_rows, vmem_limit_bytes):
    rows, lanes = slab.shape
    return pl.pallas_call(
        _relu_kernel,
        out_shape=jax.ShapeDtypeStruct((rows, lanes), slab.dtype),
        grid_spec=pl.GridSpec(
            grid=(pl.cdiv(rows, tile_rows),),
            in_specs=[pl.BlockSpec((tile_rows, lanes), lambda i: (i, 0))],
            out_specs=pl.BlockSpec((tile_rows, lanes), lambda i: (i, 0)),
        ),
        compiler_params=pltpu.CompilerParams(
            dimension_semantics=("parallel",),
            vmem_limit_bytes=vmem_limit_bytes,
        ),
        # NOTE: no input_output_aliases -- aliasing a non-donated jit argument
        # only forces XLA to insert a defensive full copy (extra HBM pass).
    )(slab)


@functools.partial(jax.jit, static_argnames=("min_pallas_bytes",))
def relu_forward(x, min_pallas_bytes=256 * 1024):
    """ReLU(x) = max(x, 0); same shape and dtype as the input."""
    n = x.size
    if n == 0:
        return x

    dtype = x.dtype
    itemsize = jnp.dtype(dtype).itemsize
    nbytes = n * itemsize

    # Tiny activations: pallas_call launch + per-step overhead dominate; a
    # plain fused XLA elementwise op is already roofline-optimal.
    if nbytes < min_pallas_bytes:
        return jnp.maximum(x, jnp.zeros((), dtype))

    # Widest lane-dense width (multiple of 128) that divides the element
    # count.  The sublane granule only constrains the block shape, not the
    # slab's row count, so any multiple of 128 elements takes the fast path
    # (last row-block may be partial; Pallas masks out-of-bounds writes).
    lanes = 0
    for cand in (1024, 512, 256, 128):
        if n % cand == 0:
            lanes = cand
            break

    if lanes == 0:
        # Truly ragged element count: pad->kernel->slice would cost ~3x HBM
        # traffic; a single fused maximum is the one-pass roofline floor.
        return jnp.maximum(x, jnp.zeros((), dtype))

    rows = n // lanes
    granule = _sublane_granule(dtype)
    tile_bytes, vmem_limit_bytes = _tile_params()

    if rows <= granule:
        # Single full-array block (block dims equal the array dims).
        tile_rows = rows
    else:
        # ~tile_bytes per tile, multiple of the sublane granule.
        tile_rows = max(
            granule, (tile_bytes // (lanes * itemsize)) // granule * granule
        )
        # Cap so the grid has >= 2 steps: with dimension_semantics
        # ("parallel",) the steps shard across v7x's two TensorCores.
        half_rows = granule * pl.cdiv(pl.cdiv(rows, 2), granule)
        tile_rows = min(tile_rows, half_rows)

    # Fast path: pure bitcast-reshape of the contiguous array (no HBM copy).
    slab = x.reshape(rows, lanes)
    out = _relu_slab(slab, tile_rows, vmem_limit_bytes)
    return out.reshape(x.shape)


if __name__ == "__main__":
    key = jax.random.PRNGKey(0)

    # Canonical small NCHW activation for the module: (2, 4, 16, 16), f32.
    x = jax.random.normal(key, (2, 4, 16, 16), dtype=jnp.float32)
    # Small inputs normally short-circuit to fused jnp.maximum; force the
    # Pallas path here so the kernel itself is exercised at this shape.
    y = jax.block_until_ready(relu_forward(x, min_pallas_bytes=0))
    assert y.shape == x.shape and y.dtype == x.dtype
    assert jnp.array_equal(y, jnp.maximum(x, 0.0)), "mismatch (f32 pallas path)"

    # Default path on the same input (tiny -> fused XLA short-circuit).
    y_sc = jax.block_until_ready(relu_forward(x))
    assert jnp.array_equal(y_sc, jnp.maximum(x, 0.0)), "mismatch (short-circuit)"

    # Larger activation (256 KiB) that takes the streamed Pallas path with
    # >= 2 grid steps (both v7x TensorCores busy).
    x_big = jax.random.normal(jax.random.PRNGKey(1), (4, 16, 32, 32), jnp.float32)
    y_big = jax.block_until_ready(relu_forward(x_big))
    assert jnp.array_equal(y_big, jnp.maximum(x_big, 0.0)), "mismatch (big f32)"

    # bf16, rows (23) not a multiple of the 16-row sublane granule: relaxed
    # fast path with a partial, masked last block -- no pad/slice copies.
    x_bf = jax.random.normal(jax.random.PRNGKey(2), (23, 8, 16), dtype=jnp.bfloat16)
    y_bf = jax.block_until_ready(relu_forward(x_bf, min_pallas_bytes=0))
    assert y_bf.dtype == jnp.bfloat16
    assert jnp.array_equal(y_bf, jnp.maximum(x_bf, jnp.bfloat16(0))), "mismatch (bf16)"

    # Truly ragged element count (not divisible by 128) -> fused fallback.
    x_rag = jax.random.normal(jax.random.PRNGKey(3), (3, 5, 7, 9), dtype=jnp.float32)
    y_rag = jax.block_until_ready(relu_forward(x_rag))
    assert jnp.array_equal(y_rag, jnp.maximum(x_rag, 0.0)), "mismatch (ragged)"

    # TODO(synk): the PyTorch module also stashes `self.save` for backward();
    # only the forward pass is implemented here.
    print("KERNEL_OK")
</pallas_src>

<mosaic_0001>
module attributes {stable_mosaic.version = 11 : i64} {
  func.func @_relu_kernel(%arg0: i32, %arg1: memref<2x1024xf32, #tpu.memory_space<vmem>>, %arg2: memref<2x1024xf32, #tpu.memory_space<vmem>>) attributes {dimension_semantics = [#tpu.dimension_semantics<parallel>], iteration_bounds = array<i64: 1>, scalar_prefetch = 0 : i64, scratch_operands = 0 : i64, tpu.core_type = #tpu.core_type<tc>, window_params = [{transform_indices = @transform_0, window_bounds = array<i64: 2, 1024>}, {transform_indices = @transform_1, window_bounds = array<i64: 2, 1024>}]} {
    %c0 = arith.constant 0 : index
    %c0_0 = arith.constant 0 : index
    %0 = vector.load %arg1[%c0, %c0_0] : memref<2x1024xf32, #tpu.memory_space<vmem>>, vector<2x1024xf32>
    %cst = arith.constant 0.000000e+00 : f32
    %1 = vector.broadcast %cst : f32 to vector<2x1024xf32>
    %2 = arith.maximumf %0, %1 : vector<2x1024xf32>
    %c0_1 = arith.constant 0 : index
    %c0_2 = arith.constant 0 : index
    %3 = vector.load %arg2[%c0_1, %c0_2] : memref<2x1024xf32, #tpu.memory_space<vmem>>, vector<2x1024xf32>
    tpu.vector_store %arg2[%c0_1, %c0_2], %2 {strides = array<i32>} : memref<2x1024xf32, #tpu.memory_space<vmem>>, vector<2x1024xf32>,
    return
  }
  func.func @transform_0(%arg0: i32) -> (i32, i32) {
    %c0_i32 = arith.constant 0 : i32
    %c0_i32_0 = arith.constant 0 : i32
    return %arg0, %c0_i32 : i32, i32
  }
  func.func @transform_1(%arg0: i32) -> (i32, i32) {
    %c0_i32 = arith.constant 0 : i32
    %c0_i32_0 = arith.constant 0 : i32
    return %arg0, %c0_i32 : i32, i32
  }
}

</mosaic_0001>

<bundles_post_ra>
// kernel: relu_forward.1
= control target key start
LH: loop header
LB: loop body
LE: loop exit
PB: predicated region body
PF: predicated region fallthrough
CT: control target
= control target key end

     0   :  { %s40_s0 = inlined_call_operand.vmem [shape: f32[2,1024], index: 0, kind: input, shape index: {}]   ;;  %s41_s1 = inlined_call_operand.vmem [shape: f32[2,1024], index: 1, kind: output, shape index: {}]  }
   0x1   :  { %v8_v0 = vld [vmem:[%s40_s0] sm:$0xff]  ;;  %v9_v1 = vld [vmem:[%s40_s0 + $0x8] sm:$0xff] }
   0x2   :  { %v10_v2 = vmax.f32 %v8_v0, 0.0  ;;  %v11_v3 = vmax.f32 %v9_v1, 0.0 }
   0x4   :  { %12 = vst [vmem:[%s41_s1] sm:$0xff] %v10_v2  ;;  %13 = vst [vmem:[%s41_s1 + $0x8] sm:$0xff] %v11_v3 }

</bundles_post_ra>
